<compile_context>
chip_gen: v5e
topology: v5e:2x2
jax: 0.10.0
libtpu: 0.0.40
codegen_flags: <defaults>
</compile_context>

<pallas_src>
import functools

import jax
import jax.numpy as jnp
from jax.experimental import pallas as pl
from jax.experimental.pallas import tpu as pltpu


def _round_up(x: int, m: int) -> int:
    return ((x + m - 1) // m) * m


def _cdiv(a: int, b: int) -> int:
    return (a + b - 1) // b


def _fused_mlp_kernel(*refs, num_layers: int):
    """refs = (x_ref, w0_ref, b0_ref, w1_ref, b1_ref, ..., o_ref).

    Whole MLP for one row tile; activation stays in vregs/VMEM between layers, bias-add and
    ReLU happen in f32, MXU accumulates in f32 (preferred_element_type).
    """
    x_ref = refs[0]
    o_ref = refs[-1]

    act = x_ref[...]
    for li in range(num_layers):
        w_ref = refs[1 + 2 * li]
        b_ref = refs[2 + 2 * li]
        lhs = act if act.dtype == w_ref.dtype else act.astype(w_ref.dtype)
        act = jnp.dot(lhs, w_ref[...], preferred_element_type=jnp.float32)
        act = act + b_ref[...].astype(jnp.float32)  # (1, N) broadcasts over the row tile
        if li < num_layers - 1:
            act = jnp.maximum(act, 0.0)
    o_ref[...] = act.astype(o_ref.dtype)


def prepare_mlp_params(params, param_dtype=None):
    """Pad/cast parameters ONCE (hoisted out of the per-call hot path).

    params: list of (w_t, b) with w_t shaped (in_features, out_features).
    param_dtype: optional opt-in compute dtype for the weights (e.g. jnp.bfloat16);
                 defaults to the parameters' own dtype (no silent downcast).
    """
    num_layers = len(params)
    assert num_layers >= 1
    dims = [params[0][0].shape[0]] + [w_t.shape[1] for (w_t, _) in params]
    pdtype = jnp.dtype(param_dtype) if param_dtype is not None else jnp.dtype(params[0][0].dtype)

    padded = []
    for li, (w_t, b) in enumerate(params):
        di, do = w_t.shape
        assert di == (dims[li] if li == 0 else dims[li])
        # Layer-0 K dim stays unpadded (full-extent block dim is legal), so x needs no
        # feature padding. Every other feature dim is lane-padded to a multiple of 128.
        dip = di if li == 0 else _round_up(di, 128)
        dop = _round_up(do, 128)
        w_p = jnp.pad(w_t.astype(pdtype), ((0, dip - di), (0, dop - do)))
        b_p = jnp.pad(b.astype(pdtype), (0, dop - do)).reshape(1, dop)
        padded.append((w_p, b_p))

    return {
        "padded_params": padded,
        "dims": dims,
        "pdtype": pdtype,
        "num_layers": num_layers,
    }


def mlp_forward_fused(x, prepared, *, tile_m: int | None = None):
    """x: (M, in_dim); prepared: output of prepare_mlp_params. Returns (M, out_dim)."""
    padded_params = prepared["padded_params"]
    dims = prepared["dims"]
    pdtype = prepared["pdtype"]
    num_layers = prepared["num_layers"]

    M, in_dim = x.shape
    assert in_dim == dims[0], "input feature dim mismatch"
    out_dim = dims[-1]
    out_dim_p = padded_params[-1][0].shape[1]
    act_dtype = x.dtype

    # bf16 vregs pack [16, 128]: keep row tiles 16-aligned when 16-bit data is involved.
    sub = 16 if (jnp.dtype(act_dtype).itemsize == 2 or pdtype.itemsize == 2) else 8

    if tile_m is None:
        # Batch-aware: aim for >= 4 grid steps (megacore sharding + DMA overlap) while
        # allowing up to 512-row tiles for large batches (per-step overhead amortization).
        tile_m = min(512, _round_up(_cdiv(M, 4), sub))
    tile_m = max(sub, _round_up(tile_m, sub))
    M_p = _round_up(M, tile_m)

    x_p = x if M_p == M else jnp.pad(x, ((0, M_p - M), (0, 0)))
    grid = (M_p // tile_m,)

    # ---- per-generation VMEM budget -------------------------------------------------------
    try:
        vmem_cap = int(pltpu.get_tpu_info().vmem_capacity_bytes)
    except Exception:  # not on TPU / info unavailable: assume v7x's 64 MiB per core
        vmem_cap = 64 * 2**20
    ceiling = (vmem_cap * 3) // 4  # ~96 MiB on 128-MiB parts, ~48 MiB on v7x

    act_bytes_pe = jnp.dtype(act_dtype).itemsize
    widths = [in_dim] + [w.shape[1] for (w, _) in padded_params]
    param_bytes = sum(w.size + b.size for (w, b) in padded_params) * pdtype.itemsize
    io_tile_bytes = tile_m * (in_dim + out_dim_p) * act_bytes_pe
    act_scratch_bytes = 2 * tile_m * max(widths) * 4  # f32 intermediates between layers
    headroom = 4 * 2**20

    if param_bytes + 2 * io_tile_bytes + act_scratch_bytes + headroom > ceiling:
        # Resident-weight fused path does not fit this generation's VMEM.
        # TODO(synk): K/N-tiled 3-D grid with f32 VMEM accumulator (pl.when init/finalize)
        # or pltpu.emit_pipeline weight streaming; plain-JAX fallback keeps it correct.
        y = x.astype(jnp.float32)
        for li, (w_p, b_p) in enumerate(padded_params):
            y = y @ w_p.astype(jnp.float32) + b_p.astype(jnp.float32)
            if li < num_layers - 1:
                y = jnp.maximum(y, 0.0)
        return y[:, :out_dim].astype(act_dtype)

    # ---- fused Pallas path -----------------------------------------------------------------
    def run(single_buffer_weights: bool):
        w_kwargs = {}
        if single_buffer_weights and hasattr(pl, "Buffered"):
            # Constant index_map => nothing to double-buffer; halves resident param VMEM.
            w_kwargs = dict(pipeline_mode=pl.Buffered(1))

        in_specs = [pl.BlockSpec((tile_m, in_dim), lambda i: (i, 0))]  # row tile of x
        flat_inputs = [x_p]
        for w_p, b_p in padded_params:
            in_specs.append(pl.BlockSpec(w_p.shape, lambda i: (0, 0), **w_kwargs))
            in_specs.append(pl.BlockSpec(b_p.shape, lambda i: (0, 0), **w_kwargs))
            flat_inputs += [w_p, b_p]
        out_specs = pl.BlockSpec((tile_m, out_dim_p), lambda i: (i, 0))

        pmult = 1 if single_buffer_weights else 2
        vmem_limit = int(
            min(
                max(
                    pmult * param_bytes + 2 * io_tile_bytes + act_scratch_bytes + headroom,
                    16 * 2**20,
                ),
                ceiling,
            )
        )

        kernel = functools.partial(_fused_mlp_kernel, num_layers=num_layers)
        return pl.pallas_call(
            kernel,
            out_shape=jax.ShapeDtypeStruct((M_p, out_dim_p), act_dtype),
            grid_spec=pltpu.PrefetchScalarGridSpec(
                num_scalar_prefetch=0,
                grid=grid,
                in_specs=in_specs,
                out_specs=out_specs,
            ),
            compiler_params=pltpu.CompilerParams(
                dimension_semantics=("parallel",),  # shard M tiles across TCs (v7x megacore)
                vmem_limit_bytes=vmem_limit,
            ),
        )(*flat_inputs)

    try:
        out_p = run(True)
    except Exception:
        # pl.Buffered(1) unsupported on this JAX version: default double-buffering still correct.
        out_p = run(False)

    if M_p == M and out_dim_p == out_dim:
        return out_p
    return out_p[:M, :out_dim]


def mlp_forward(x, params, *, tile_m: int | None = None, param_dtype=None):
    """Convenience wrapper (prepares params per call; prefer prepare_mlp_params once + fused)."""
    return mlp_forward_fused(x, prepare_mlp_params(params, param_dtype), tile_m=tile_m)


def init_mlp_params(key, in_dim, hidden_dim, out_dim, num_layers, dtype=jnp.float32):
    """Deterministic init matching the PyTorch module's layer shapes (weights stored transposed)."""
    h = [hidden_dim] * (num_layers - 1)
    dims_in = [in_dim] + h
    dims_out = h + [out_dim]
    params = []
    for di, do in zip(dims_in, dims_out):
        key, kw, kb = jax.random.split(key, 3)
        bound = 1.0 / jnp.sqrt(di)  # PyTorch default uniform(-1/sqrt(fan_in), 1/sqrt(fan_in))
        w_t = jax.random.uniform(kw, (di, do), dtype=dtype, minval=-bound, maxval=bound)
        b = jax.random.uniform(kb, (do,), dtype=dtype, minval=-bound, maxval=bound)
        params.append((w_t, b))
    return params


def mlp_reference(x, params):
    num_layers = len(params)
    for i, (w_t, b) in enumerate(params):
        x = x @ w_t + b
        if i < num_layers - 1:
            x = jnp.maximum(x, 0.0)
    return x


if __name__ == "__main__":
    key = jax.random.PRNGKey(0)
    in_dim, hidden_dim, out_dim, num_layers = 32, 64, 16, 3

    kx1, kx2, kx3, kp = jax.random.split(key, 4)
    params = init_mlp_params(kp, in_dim, hidden_dim, out_dim, num_layers)

    # Pad/cast parameters once (hoisted out of the per-call hot path).
    prepared_f32 = prepare_mlp_params(params)  # default: keep params' own dtype (f32)

    # Case 1: small, "nice" batch.
    x1 = jax.random.normal(kx1, (8, in_dim), dtype=jnp.float32)
    out1 = jax.block_until_ready(mlp_forward_fused(x1, prepared_f32))
    ref1 = mlp_reference(x1, params)
    assert out1.shape == (8, out_dim)
    assert jnp.allclose(out1, ref1, atol=1e-5, rtol=1e-5), "mismatch vs JAX reference (case 1)"

    # Case 2: batch not a multiple of the row tile / of 8 — exercises the padded-M path.
    x2 = jax.random.normal(kx2, (13, in_dim), dtype=jnp.float32)
    out2 = jax.block_until_ready(mlp_forward_fused(x2, prepared_f32))
    ref2 = mlp_reference(x2, params)
    assert out2.shape == (13, out_dim)
    assert jnp.allclose(out2, ref2, atol=1e-5, rtol=1e-5), "mismatch vs JAX reference (case 2)"

    # Case 3: explicit bf16 weight opt-in (f32 accumulation) — 16-aligned row tiles path.
    prepared_bf16 = prepare_mlp_params(params, param_dtype=jnp.bfloat16)
    x3 = jax.random.normal(kx3, (24, in_dim), dtype=jnp.float32)
    out3 = jax.block_until_ready(mlp_forward_fused(x3, prepared_bf16))
    ref3 = mlp_reference(x3, params)
    assert out3.shape == (24, out_dim)
    assert jnp.allclose(out3, ref3, atol=5e-2, rtol=5e-2), "mismatch vs JAX reference (case 3)"

    print("KERNEL_OK")
</pallas_src>

<mosaic_0001>
module attributes {stable_mosaic.version = 11 : i64} {
  func.func @_fused_mlp_kernel(%arg0: i32, %arg1: memref<8x32xf32, #tpu.memory_space<vmem>>, %arg2: memref<32x128xf32, #tpu.memory_space<vmem>>, %arg3: memref<1x128xf32, #tpu.memory_space<vmem>>, %arg4: memref<128x128xf32, #tpu.memory_space<vmem>>, %arg5: memref<1x128xf32, #tpu.memory_space<vmem>>, %arg6: memref<128x128xf32, #tpu.memory_space<vmem>>, %arg7: memref<1x128xf32, #tpu.memory_space<vmem>>, %arg8: memref<8x128xf32, #tpu.memory_space<vmem>>) attributes {dimension_semantics = [#tpu.dimension_semantics<parallel>], iteration_bounds = array<i64: 1>, scalar_prefetch = 0 : i64, scratch_operands = 0 : i64, tpu.core_type = #tpu.core_type<tc>, window_params = [{transform_indices = @transform_0, window_bounds = array<i64: 8, 32>}, {pipeline_mode = #tpu.pipeline_mode<synchronous>, transform_indices = @transform_1, window_bounds = array<i64: 32, 128>}, {pipeline_mode = #tpu.pipeline_mode<synchronous>, transform_indices = @transform_2, window_bounds = array<i64: 1, 128>}, {pipeline_mode = #tpu.pipeline_mode<synchronous>, transform_indices = @transform_3, window_bounds = array<i64: 128, 128>}, {pipeline_mode = #tpu.pipeline_mode<synchronous>, transform_indices = @transform_4, window_bounds = array<i64: 1, 128>}, {pipeline_mode = #tpu.pipeline_mode<synchronous>, transform_indices = @transform_5, window_bounds = array<i64: 128, 128>}, {pipeline_mode = #tpu.pipeline_mode<synchronous>, transform_indices = @transform_6, window_bounds = array<i64: 1, 128>}, {transform_indices = @transform_7, window_bounds = array<i64: 8, 128>}]} {
    %c0 = arith.constant 0 : index
    %c0_0 = arith.constant 0 : index
    %0 = vector.load %arg1[%c0, %c0_0] : memref<8x32xf32, #tpu.memory_space<vmem>>, vector<8x32xf32>
    %c0_1 = arith.constant 0 : index
    %c0_2 = arith.constant 0 : index
    %1 = vector.load %arg2[%c0_1, %c0_2] : memref<32x128xf32, #tpu.memory_space<vmem>>, vector<32x128xf32>
    %cst = arith.constant dense<0.000000e+00> : vector<8x128xf32>
    %2 = tpu.matmul %0, %1, %cst {dimension_numbers = #tpu.dot_dimension_numbers<[1], [0], [0], [1], [0, 0, 1, 1], [], []>} : vector<8x32xf32>, vector<32x128xf32>, vector<8x128xf32> -> vector<8x128xf32>
    %c0_3 = arith.constant 0 : index
    %c0_4 = arith.constant 0 : index
    %3 = vector.load %arg3[%c0_3, %c0_4] : memref<1x128xf32, #tpu.memory_space<vmem>>, vector<1x128xf32>
    %4 = vector.broadcast %3 : vector<1x128xf32> to vector<8x128xf32>
    %5 = arith.addf %2, %4 : vector<8x128xf32>
    %cst_5 = arith.constant 0.000000e+00 : f32
    %6 = vector.broadcast %cst_5 : f32 to vector<8x128xf32>
    %7 = arith.maximumf %5, %6 : vector<8x128xf32>
    %c0_6 = arith.constant 0 : index
    %c0_7 = arith.constant 0 : index
    %8 = vector.load %arg4[%c0_6, %c0_7] : memref<128x128xf32, #tpu.memory_space<vmem>>, vector<128x128xf32>
    %cst_8 = arith.constant dense<0.000000e+00> : vector<8x128xf32>
    %9 = tpu.matmul %7, %8, %cst_8 {dimension_numbers = #tpu.dot_dimension_numbers<[1], [0], [0], [1], [0, 0, 1, 1], [], []>} : vector<8x128xf32>, vector<128x128xf32>, vector<8x128xf32> -> vector<8x128xf32>
    %c0_9 = arith.constant 0 : index
    %c0_10 = arith.constant 0 : index
    %10 = vector.load %arg5[%c0_9, %c0_10] : memref<1x128xf32, #tpu.memory_space<vmem>>, vector<1x128xf32>
    %11 = vector.broadcast %10 : vector<1x128xf32> to vector<8x128xf32>
    %12 = arith.addf %9, %11 : vector<8x128xf32>
    %cst_11 = arith.constant 0.000000e+00 : f32
    %13 = vector.broadcast %cst_11 : f32 to vector<8x128xf32>
    %14 = arith.maximumf %12, %13 : vector<8x128xf32>
    %c0_12 = arith.constant 0 : index
    %c0_13 = arith.constant 0 : index
    %15 = vector.load %arg6[%c0_12, %c0_13] : memref<128x128xf32, #tpu.memory_space<vmem>>, vector<128x128xf32>
    %cst_14 = arith.constant dense<0.000000e+00> : vector<8x128xf32>
    %16 = tpu.matmul %14, %15, %cst_14 {dimension_numbers = #tpu.dot_dimension_numbers<[1], [0], [0], [1], [0, 0, 1, 1], [], []>} : vector<8x128xf32>, vector<128x128xf32>, vector<8x128xf32> -> vector<8x128xf32>
    %c0_15 = arith.constant 0 : index
    %c0_16 = arith.constant 0 : index
    %17 = vector.load %arg7[%c0_15, %c0_16] : memref<1x128xf32, #tpu.memory_space<vmem>>, vector<1x128xf32>
    %18 = vector.broadcast %17 : vector<1x128xf32> to vector<8x128xf32>
    %19 = arith.addf %16, %18 : vector<8x128xf32>
    %c0_17 = arith.constant 0 : index
    %c0_18 = arith.constant 0 : index
    %20 = vector.load %arg8[%c0_17, %c0_18] : memref<8x128xf32, #tpu.memory_space<vmem>>, vector<8x128xf32>
    tpu.vector_store %arg8[%c0_17, %c0_18], %19 {strides = array<i32>} : memref<8x128xf32, #tpu.memory_space<vmem>>, vector<8x128xf32>,
    return
  }
  func.func @transform_0(%arg0: i32) -> (i32, i32) {
    %c0_i32 = arith.constant 0 : i32
    %c0_i32_0 = arith.constant 0 : i32
    return %arg0, %c0_i32 : i32, i32
  }
  func.func @transform_1(%arg0: i32) -> (i32, i32) {
    %c0_i32 = arith.constant 0 : i32
    %c0_i32_0 = arith.constant 0 : i32
    %c0_i32_1 = arith.constant 0 : i32
    return %c0_i32, %c0_i32_0 : i32, i32
  }
  func.func @transform_2(%arg0: i32) -> (i32, i32) {
    %c0_i32 = arith.constant 0 : i32
    %c0_i32_0 = arith.constant 0 : i32
    %c0_i32_1 = arith.constant 0 : i32
    return %c0_i32, %c0_i32_0 : i32, i32
  }
  func.func @transform_3(%arg0: i32) -> (i32, i32) {
    %c0_i32 = arith.constant 0 : i32
    %c0_i32_0 = arith.constant 0 : i32
    %c0_i32_1 = arith.constant 0 : i32
    return %c0_i32, %c0_i32_0 : i32, i32
  }
  func.func @transform_4(%arg0: i32) -> (i32, i32) {
    %c0_i32 = arith.constant 0 : i32
    %c0_i32_0 = arith.constant 0 : i32
    %c0_i32_1 = arith.constant 0 : i32
    return %c0_i32, %c0_i32_0 : i32, i32
  }
  func.func @transform_5(%arg0: i32) -> (i32, i32) {
    %c0_i32 = arith.constant 0 : i32
    %c0_i32_0 = arith.constant 0 : i32
    %c0_i32_1 = arith.constant 0 : i32
    return %c0_i32, %c0_i32_0 : i32, i32
  }
  func.func @transform_6(%arg0: i32) -> (i32, i32) {
    %c0_i32 = arith.constant 0 : i32
    %c0_i32_0 = arith.constant 0 : i32
    %c0_i32_1 = arith.constant 0 : i32
    return %c0_i32, %c0_i32_0 : i32, i32
  }
  func.func @transform_7(%arg0: i32) -> (i32, i32) {
    %c0_i32 = arith.constant 0 : i32
    %c0_i32_0 = arith.constant 0 : i32
    return %arg0, %c0_i32 : i32, i32
  }
}

module attributes {stable_mosaic.version = 11 : i64} {
  func.func @_fused_mlp_kernel(%arg0: i32, %arg1: memref<8x32xf32, #tpu.memory_space<vmem>>, %arg2: memref<32x128xf32, #tpu.memory_space<vmem>>, %arg3: memref<1x128xf32, #tpu.memory_space<vmem>>, %arg4: memref<128x128xf32, #tpu.memory_space<vmem>>, %arg5: memref<1x128xf32, #tpu.memory_space<vmem>>, %arg6: memref<128x128xf32, #tpu.memory_space<vmem>>, %arg7: memref<1x128xf32, #tpu.memory_space<vmem>>, %arg8: memref<8x128xf32, #tpu.memory_space<vmem>>) attributes {dimension_semantics = [#tpu.dimension_semantics<parallel>], iteration_bounds = array<i64: 1>, scalar_prefetch = 0 : i64, scratch_operands = 0 : i64, tpu.core_type = #tpu.core_type<tc>, window_params = [{transform_indices = @transform_0, window_bounds = array<i64: 8, 32>}, {pipeline_mode = #tpu.pipeline_mode<synchronous>, transform_indices = @transform_1, window_bounds = array<i64: 32, 128>}, {pipeline_mode = #tpu.pipeline_mode<synchronous>, transform_indices = @transform_2, window_bounds = array<i64: 1, 128>}, {pipeline_mode = #tpu.pipeline_mode<synchronous>, transform_indices = @transform_3, window_bounds = array<i64: 128, 128>}, {pipeline_mode = #tpu.pipeline_mode<synchronous>, transform_indices = @transform_4, window_bounds = array<i64: 1, 128>}, {pipeline_mode = #tpu.pipeline_mode<synchronous>, transform_indices = @transform_5, window_bounds = array<i64: 128, 128>}, {pipeline_mode = #tpu.pipeline_mode<synchronous>, transform_indices = @transform_6, window_bounds = array<i64: 1, 128>}, {transform_indices = @transform_7, window_bounds = array<i64: 8, 128>}]} {
    %c0 = arith.constant 0 : index
    %c0_0 = arith.constant 0 : index
    %0 = vector.load %arg1[%c0, %c0_0] : memref<8x32xf32, #tpu.memory_space<vmem>>, vector<8x32xf32>
    %c0_1 = arith.constant 0 : index
    %c0_2 = arith.constant 0 : index
    %1 = vector.load %arg2[%c0_1, %c0_2] : memref<32x128xf32, #tpu.memory_space<vmem>>, vector<32x128xf32>
    %cst = arith.constant dense<0.000000e+00> : vector<8x128xf32>
    %2 = tpu.matmul %0, %1, %cst {dimension_numbers = #tpu.dot_dimension_numbers<[1], [0], [0], [1], [0, 0, 1, 1], [], []>} : vector<8x32xf32>, vector<32x128xf32>, vector<8x128xf32> -> vector<8x128xf32>
    %c0_3 = arith.constant 0 : index
    %c0_4 = arith.constant 0 : index
    %3 = vector.load %arg3[%c0_3, %c0_4] : memref<1x128xf32, #tpu.memory_space<vmem>>, vector<1x128xf32>
    %4 = vector.broadcast %3 : vector<1x128xf32> to vector<8x128xf32>
    %5 = arith.addf %2, %4 : vector<8x128xf32>
    %cst_5 = arith.constant 0.000000e+00 : f32
    %6 = vector.broadcast %cst_5 : f32 to vector<8x128xf32>
    %7 = arith.maximumf %5, %6 : vector<8x128xf32>
    %c0_6 = arith.constant 0 : index
    %c0_7 = arith.constant 0 : index
    %8 = vector.load %arg4[%c0_6, %c0_7] : memref<128x128xf32, #tpu.memory_space<vmem>>, vector<128x128xf32>
    %cst_8 = arith.constant dense<0.000000e+00> : vector<8x128xf32>
    %9 = tpu.matmul %7, %8, %cst_8 {dimension_numbers = #tpu.dot_dimension_numbers<[1], [0], [0], [1], [0, 0, 1, 1], [], []>} : vector<8x128xf32>, vector<128x128xf32>, vector<8x128xf32> -> vector<8x128xf32>
    %c0_9 = arith.constant 0 : index
    %c0_10 = arith.constant 0 : index
    %10 = vector.load %arg5[%c0_9, %c0_10] : memref<1x128xf32, #tpu.memory_space<vmem>>, vector<1x128xf32>
    %11 = vector.broadcast %10 : vector<1x128xf32> to vector<8x128xf32>
    %12 = arith.addf %9, %11 : vector<8x128xf32>
    %cst_11 = arith.constant 0.000000e+00 : f32
    %13 = vector.broadcast %cst_11 : f32 to vector<8x128xf32>
    %14 = arith.maximumf %12, %13 : vector<8x128xf32>
    %c0_12 = arith.constant 0 : index
    %c0_13 = arith.constant 0 : index
    %15 = vector.load %arg6[%c0_12, %c0_13] : memref<128x128xf32, #tpu.memory_space<vmem>>, vector<128x128xf32>
    %cst_14 = arith.constant dense<0.000000e+00> : vector<8x128xf32>
    %16 = tpu.matmul %14, %15, %cst_14 {dimension_numbers = #tpu.dot_dimension_numbers<[1], [0], [0], [1], [0, 0, 1, 1], [], []>} : vector<8x128xf32>, vector<128x128xf32>, vector<8x128xf32> -> vector<8x128xf32>
    %c0_15 = arith.constant 0 : index
    %c0_16 = arith.constant 0 : index
    %17 = vector.load %arg7[%c0_15, %c0_16] : memref<1x128xf32, #tpu.memory_space<vmem>>, vector<1x128xf32>
    %18 = vector.broadcast %17 : vector<1x128xf32> to vector<8x128xf32>
    %19 = arith.addf %16, %18 : vector<8x128xf32>
    %c0_17 = arith.constant 0 : index
    %c0_18 = arith.constant 0 : index
    %20 = vector.load %arg8[%c0_17, %c0_18] : memref<8x128xf32, #tpu.memory_space<vmem>>, vector<8x128xf32>
    tpu.vector_store %arg8[%c0_17, %c0_18], %19 {strides = array<i32>} : memref<8x128xf32, #tpu.memory_space<vmem>>, vector<8x128xf32>,
    return
  }
  func.func @transform_0(%arg0: i32) -> (i32, i32) {
    %c0_i32 = arith.constant 0 : i32
    %c0_i32_0 = arith.constant 0 : i32
    return %arg0, %c0_i32 : i32, i32
  }
  func.func @transform_1(%arg0: i32) -> (i32, i32) {
    %c0_i32 = arith.constant 0 : i32
    %c0_i32_0 = arith.constant 0 : i32
    %c0_i32_1 = arith.constant 0 : i32
    return %c0_i32, %c0_i32_0 : i32, i32
  }
  func.func @transform_2(%arg0: i32) -> (i32, i32) {
    %c0_i32 = arith.constant 0 : i32
    %c0_i32_0 = arith.constant 0 : i32
    %c0_i32_1 = arith.constant 0 : i32
    return %c0_i32, %c0_i32_0 : i32, i32
  }
  func.func @transform_3(%arg0: i32) -> (i32, i32) {
    %c0_i32 = arith.constant 0 : i32
    %c0_i32_0 = arith.constant 0 : i32
    %c0_i32_1 = arith.constant 0 : i32
    return %c0_i32, %c0_i32_0 : i32, i32
  }
  func.func @transform_4(%arg0: i32) -> (i32, i32) {
    %c0_i32 = arith.constant 0 : i32
    %c0_i32_0 = arith.constant 0 : i32
    %c0_i32_1 = arith.constant 0 : i32
    return %c0_i32, %c0_i32_0 : i32, i32
  }
  func.func @transform_5(%arg0: i32) -> (i32, i32) {
    %c0_i32 = arith.constant 0 : i32
    %c0_i32_0 = arith.constant 0 : i32
    %c0_i32_1 = arith.constant 0 : i32
    return %c0_i32, %c0_i32_0 : i32, i32
  }
  func.func @transform_6(%arg0: i32) -> (i32, i32) {
    %c0_i32 = arith.constant 0 : i32
    %c0_i32_0 = arith.constant 0 : i32
    %c0_i32_1 = arith.constant 0 : i32
    return %c0_i32, %c0_i32_0 : i32, i32
  }
  func.func @transform_7(%arg0: i32) -> (i32, i32) {
    %c0_i32 = arith.constant 0 : i32
    %c0_i32_0 = arith.constant 0 : i32
    return %arg0, %c0_i32 : i32, i32
  }
}

</mosaic_0001>

<bundles_post_ra>
// kernel: tpu_custom_call.1
= control target key start
LH: loop header
LB: loop body
LE: loop exit
PB: predicated region body
PF: predicated region fallthrough
CT: control target
= control target key end

     0   :  { %12 = vsyncpa [#allocation3], 0  ;;  %s433_s0 = inlined_call_operand.hbm [shape: f32[8,32], index: 0, kind: input, shape index: {}]   ;;  %s434_s1 = inlined_call_operand.hbm [shape: f32[32,128], index: 1, kind: input, shape index: {}]   ;;  %s435_s2 = inlined_call_operand.vmem [shape: f32[1,128], index: 2, kind: input, shape index: {}]   ;;  %s436_s3 = inlined_call_operand.hbm [shape: f32[128,128], index: 3, kind: input, shape index: {}]   ;;  %s437_s4 = inlined_call_operand.vmem [shape: f32[1,128], index: 4, kind: input, shape index: {}]   ;;  %s438_s5 = inlined_call_operand.hbm [shape: f32[128,128], index: 5, kind: input, shape index: {}]   ;;  %s439_s6 = inlined_call_operand.vmem [shape: f32[1,128], index: 6, kind: input, shape index: {}]   ;;  %s440_s7 = inlined_call_operand.hbm [shape: f32[8,128], index: 7, kind: output, shape index: {}]  }
   0x1   :  { %13 = vsyncpa [#allocation6], 0 }
   0x2   :  { %14 = vsyncpa [#allocation9], 0  ;;  %s31_s26 = sshll.u32 %s434_s1, 4  ;;  %s32_s26 = int_to_ptr.hbm [resolvable:$true] %s31_s26 }
   0x3   :  { %15 = vsyncpa [#allocation4], 0  ;;  %s362_s27 = smov [#allocation5]   ;;  %s21_s8 = sshll.u32 %s433_s0, 4  ;;  %s22_s8 = int_to_ptr.hbm [resolvable:$true] %s21_s8 }
   0x4   :  { %s33_s28 = sshll.u32 %s362_s27, 4  ;;  %s363_s9 = smov 128   ;;  %s34_s28 = int_to_ptr.vmem [resolvable:$true] %s33_s28 }
   0x5   :  { %s364_s10 = smov 8   ;;  %s365_s11 = smov [#allocation2]  }
   0x6   :  { %39 = dma.hbm_to_vmem [thread:$0]  %s32_s26, 512, %s34_s28, [#allocation6], %s363_s9, %s363_s9, %s364_s10  }
   0x7   :  { %s23_s12 = sshll.u32 %s365_s11, 4  ;;  %s46_s15 = sshll.u32 %s436_s3, 4  ;;  %s24_s12 = int_to_ptr.vmem [resolvable:$true] %s23_s12  ;;  %s47_s15 = int_to_ptr.hbm [resolvable:$true] %s46_s15 }
   0x8   :  { %26 = dma.hbm_to_vmem [thread:$0]  %s22_s8, 128, %s24_s12, [#allocation3]  }
   0x9   :  { %s61_s17 = sshll.u32 %s438_s5, 4  ;;  %s366_s18 = smov [#allocation7]   ;;  %s62_s17 = int_to_ptr.hbm [resolvable:$true] %s61_s17 }
   0xa   :  { %s48_s19 = sshll.u32 %s366_s18, 4  ;;  %s367_s0 = smov [#allocation8]   ;;  %s49_s19 = int_to_ptr.vmem [resolvable:$true] %s48_s19 }
   0xb   :  { %54 = dma.hbm_to_vmem [thread:$0]  %s47_s15, 2048, %s49_s19, [#allocation6], %s363_s9, %s363_s9, %s364_s10  }
   0xc   :  { %s63_s20 = sshll.u32 %s367_s0, 4  ;;  %s64_s20 = int_to_ptr.vmem [resolvable:$true] %s63_s20 }
   0xd   :  { %69 = dma.hbm_to_vmem [thread:$0]  %s62_s17, 2048, %s64_s20, [#allocation9], %s363_s9, %s363_s9, %s364_s10  }
   0xe   :  { %354 = dma.done.wait [#allocation3], 128  }
   0xf   :  { %355 = vsyncadd [#allocation3], 4294967168 }
  0x10   :  { %356 = dma.done.wait [#allocation6], 2560  }
  0x11   :  { %357 = vsyncadd [#allocation6], 4294964736 }
  0x12   :  { %358 = dma.done.wait [#allocation9], 2048  }
  0x13   :  { %359 = vsyncadd [#allocation9], 4294965248  ;;  %v92_v0 = vld [vmem:[#allocation5 + $0x18] sm:$0xff]  ;;  %v91_v1 = vld [vmem:[#allocation5 + $0x10] sm:$0xff]  ;;  %vm97_vm0 = vcmask 261120   ;;  %s368_s24 = smov [#allocation10]  }
  0x14   :  { %113 = vmatpush.msra.mxu0 %v92_v0  ;;  %v137_v2 = vld [vmem:[#allocation7 + $0x78] sm:$0xff]  ;;  %v90_v3 = vld [vmem:[#allocation5 + $0x8] sm:$0xff]  ;;  %v136_v4 = vld [vmem:[#allocation7 + $0x70] sm:$0xff]  ;;  %s209_s25 = sshll.u32 %s368_s24, 4  ;;  %s211_s28 = sshll.u32 %s440_s7, 4  ;;  %s210_s25 = int_to_ptr.vmem [resolvable:$true] %s209_s25  ;;  %s212_s28 = int_to_ptr.hbm [resolvable:$true] %s211_s28 }
  0x15   :  { %142 = vmatpush.msra.mxu1 %v137_v2  ;;  %v135_v5 = vld [vmem:[#allocation7 + $0x68] sm:$0xff]  ;;  %v89_v6 = vld [vmem:[#allocation5] sm:$0xff]  ;;  %v88_v7 = vld [vmem:[#allocation2] sm:$0xff] }
  0x16   :  { %114 = vmatpush.msra.mxu0 %v91_v1  ;;  %v134_v8 = vld [vmem:[#allocation7 + $0x60] sm:$0xff]  ;;  %v133_v9 = vld [vmem:[#allocation7 + $0x58] sm:$0xff]  ;;  %v132_v10 = vld [vmem:[#allocation7 + $0x50] sm:$0xff] }
  0x17   :  { %143 = vmatpush.msra.mxu1 %v136_v4  ;;  %v131_v11 = vld [vmem:[#allocation7 + $0x48] sm:$0xff]  ;;  %v130_v12 = vld [vmem:[#allocation7 + $0x40] sm:$0xff]  ;;  %v129_v13 = vld [vmem:[#allocation7 + $0x38] sm:$0xff] }
  0x18   :  { %115 = vmatpush.msra.mxu0 %v90_v3  ;;  %v128_v14 = vld [vmem:[#allocation7 + $0x30] sm:$0xff]  ;;  %v127_v15 = vld [vmem:[#allocation7 + $0x28] sm:$0xff]  ;;  %v126_v16 = vld [vmem:[#allocation7 + $0x20] sm:$0xff] }
  0x19   :  { %144 = vmatpush.msra.mxu1 %v135_v5  ;;  %v125_v17 = vld [vmem:[#allocation7 + $0x18] sm:$0xff]  ;;  %v124_v18 = vld [vmem:[#allocation7 + $0x10] sm:$0xff]  ;;  %v123_v19 = vld [vmem:[#allocation7 + $0x8] sm:$0xff] }
  0x1a   :  { %116 = vmatpush.msra.mxu0 %v89_v6  ;;  %v122_v20 = vld [vmem:[#allocation7] sm:$0xff]  ;;  %v178_v21 = vld [vmem:[#allocation8 + $0x78] sm:$0xff]  ;;  %v177_v22 = vld [vmem:[#allocation8 + $0x70] sm:$0xff] }
  0x1b   :  { %223 = vmatmul.msk.f32.vlgmr.msra.gmra.mxu0 %vm97_vm0, %v88_v7  ;;  %145 = vmatpush.msra.mxu1 %v134_v8  ;;  %v176_v23 = vld [vmem:[#allocation8 + $0x68] sm:$0xff]  ;;  %v175_v24 = vld [vmem:[#allocation8 + $0x60] sm:$0xff]  ;;  %v174_v25 = vld [vmem:[#allocation8 + $0x58] sm:$0xff] }
  0x1c   :  { %183 = vmatpush.msra.mxu2 %v178_v21  ;;  %v173_v26 = vld [vmem:[#allocation8 + $0x50] sm:$0xff]  ;;  %v172_v27 = vld [vmem:[#allocation8 + $0x48] sm:$0xff]  ;;  %v171_v28 = vld [vmem:[#allocation8 + $0x40] sm:$0xff] }
  0x1d   :  { %146 = vmatpush.msra.mxu1 %v133_v9  ;;  %v170_v29 = vld [vmem:[#allocation8 + $0x38] sm:$0xff]  ;;  %v169_v30 = vld [vmem:[#allocation8 + $0x30] sm:$0xff]  ;;  %v168_v31 = vld [vmem:[#allocation8 + $0x28] sm:$0xff] }
  0x1e   :  { %184 = vmatpush.msra.mxu2 %v177_v22  ;;  %v167_v32 = vld [vmem:[#allocation8 + $0x20] sm:$0xff]  ;;  %v166_v33 = vld [vmem:[#allocation8 + $0x18] sm:$0xff]  ;;  %v165_v38 = vld [vmem:[#allocation8 + $0x10] sm:$0xff] }
  0x1f   :  { %147 = vmatpush.msra.mxu1 %v132_v10  ;;  %v231_v34 = vld [vmem:[%s435_s2] ss:$0 sm:$0xff]  ;;  %v164_v39 = vld [vmem:[#allocation8 + $0x8] sm:$0xff]  ;;  %v163_v40 = vld [vmem:[#allocation8] sm:$0xff] }
  0x20   :  { %185 = vmatpush.msra.mxu2 %v176_v23  ;;  %v232_v41 = vld [vmem:[%s437_s4] ss:$0 sm:$0xff] }
  0x21   :  { %148 = vmatpush.msra.mxu1 %v131_v11  ;;  %v233_v45 = vld [vmem:[%s439_s6] ss:$0 sm:$0xff] }
  0x22   :  { %186 = vmatpush.msra.mxu2 %v175_v24 }
  0x23   :  { %149 = vmatpush.msra.mxu1 %v130_v12 }
  0x24   :  { %187 = vmatpush.msra.mxu2 %v174_v25 }
  0x25   :  { %150 = vmatpush.msra.mxu1 %v129_v13 }
  0x26   :  { %188 = vmatpush.msra.mxu2 %v173_v26 }
  0x27   :  { %151 = vmatpush.msra.mxu1 %v128_v14 }
  0x28   :  { %189 = vmatpush.msra.mxu2 %v172_v27 }
  0x29   :  { %152 = vmatpush.msra.mxu1 %v127_v15 }
  0x2a   :  { %190 = vmatpush.msra.mxu2 %v171_v28 }
  0x2b   :  { %153 = vmatpush.msra.mxu1 %v126_v16 }
  0x2c   :  { %191 = vmatpush.msra.mxu2 %v170_v29 }
  0x2d   :  { %154 = vmatpush.msra.mxu1 %v125_v17 }
  0x2e   :  { %192 = vmatpush.msra.mxu2 %v169_v30 }
  0x2f   :  { %155 = vmatpush.msra.mxu1 %v124_v18 }
  0x30   :  { %193 = vmatpush.msra.mxu2 %v168_v31 }
  0x31   :  { %156 = vmatpush.msra.mxu1 %v123_v19 }
  0x32   :  { %194 = vmatpush.msra.mxu2 %v167_v32 }
  0x33   :  { %157 = vmatpush.msra.mxu1 %v122_v20 }
  0x34   :  { %195 = vmatpush.msra.mxu2 %v166_v33 }
  0x36   :  { %196 = vmatpush.msra.mxu2 %v165_v38 }
  0x38   :  { %197 = vmatpush.msra.mxu2 %v164_v39 }
  0x3a   :  { %198 = vmatpush.msra.mxu2 %v163_v40 }
  0x98   :  { %v118_v35 = vpop.f32.mrf.mxu0 }
  0x99   :  { %v119_v36 = vadd.f32 %v231_v34, %v118_v35 }
  0x9b   :  { %v121_v37 = vmax.f32 %v119_v36, 0.0 }
  0x9d   :  { %158 = vmatmul.f32.vlgmr.msra.gmra.mxu1 %v121_v37 }
 0x11a   :  { %v159_v42 = vpop.f32.mrf.mxu1 }
 0x11b   :  { %v160_v43 = vadd.f32 %v232_v41, %v159_v42 }
 0x11d   :  { %v162_v44 = vmax.f32 %v160_v43, 0.0 }
 0x11f   :  { %199 = vmatmul.f32.vlgmr.msra.gmra.mxu2 %v162_v44 }
 0x1a2   :  { %v200_v46 = vpop.f32.mrf.mxu2 }
 0x1a3   :  { %v201_v47 = vadd.f32 %v233_v45, %v200_v46 }
 0x1a5   :  { %203 = vst [vmem:[#allocation10] sm:$0xff] %v201_v47 }
 0x1a6   :  { %214 = dma.vmem_to_hbm [thread:$0]  %s210_s25, 128, %s212_s28, [#allocation4]  }
 0x1a7   :  { %360 = dma.done.wait [#allocation4], 128  }
 0x1a8   :  { %361 = vsyncadd [#allocation4], 4294967168 }
 0x1a9   :  { %219 = vsyncpa [#allocation3], 1 }
 0x1aa   :  { %220 = vsyncpa [#allocation6], 1 }
 0x1ab   :  { %221 = vsyncpa [#allocation9], 1 }
 0x1ac   :  { %222 = vsyncpa [#allocation4], 1 }

// kernel: tpu_custom_call.1
= control target key start
LH: loop header
LB: loop body
LE: loop exit
PB: predicated region body
PF: predicated region fallthrough
CT: control target
= control target key end

     0   :  { %12 = vsyncpa [#allocation3], 0  ;;  %s433_s0 = inlined_call_operand.hbm [shape: f32[8,32], index: 0, kind: input, shape index: {}]   ;;  %s434_s1 = inlined_call_operand.hbm [shape: f32[32,128], index: 1, kind: input, shape index: {}]   ;;  %s435_s2 = inlined_call_operand.vmem [shape: f32[1,128], index: 2, kind: input, shape index: {}]   ;;  %s436_s3 = inlined_call_operand.hbm [shape: f32[128,128], index: 3, kind: input, shape index: {}]   ;;  %s437_s4 = inlined_call_operand.vmem [shape: f32[1,128], index: 4, kind: input, shape index: {}]   ;;  %s438_s5 = inlined_call_operand.hbm [shape: f32[128,128], index: 5, kind: input, shape index: {}]   ;;  %s439_s6 = inlined_call_operand.vmem [shape: f32[1,128], index: 6, kind: input, shape index: {}]   ;;  %s440_s7 = inlined_call_operand.hbm [shape: f32[8,128], index: 7, kind: output, shape index: {}]  }
   0x1   :  { %13 = vsyncpa [#allocation6], 0 }
   0x2   :  { %14 = vsyncpa [#allocation9], 0  ;;  %s31_s26 = sshll.u32 %s434_s1, 4  ;;  %s32_s26 = int_to_ptr.hbm [resolvable:$true] %s31_s26 }
   0x3   :  { %15 = vsyncpa [#allocation4], 0  ;;  %s362_s27 = smov [#allocation5]   ;;  %s21_s8 = sshll.u32 %s433_s0, 4  ;;  %s22_s8 = int_to_ptr.hbm [resolvable:$true] %s21_s8 }
   0x4   :  { %s33_s28 = sshll.u32 %s362_s27, 4  ;;  %s363_s9 = smov 128   ;;  %s34_s28 = int_to_ptr.vmem [resolvable:$true] %s33_s28 }
   0x5   :  { %s364_s10 = smov 8   ;;  %s365_s11 = smov [#allocation2]  }
   0x6   :  { %39 = dma.hbm_to_vmem [thread:$0]  %s32_s26, 512, %s34_s28, [#allocation6], %s363_s9, %s363_s9, %s364_s10  }
   0x7   :  { %s23_s12 = sshll.u32 %s365_s11, 4  ;;  %s46_s15 = sshll.u32 %s436_s3, 4  ;;  %s24_s12 = int_to_ptr.vmem [resolvable:$true] %s23_s12  ;;  %s47_s15 = int_to_ptr.hbm [resolvable:$true] %s46_s15 }
   0x8   :  { %26 = dma.hbm_to_vmem [thread:$0]  %s22_s8, 128, %s24_s12, [#allocation3]  }
   0x9   :  { %s61_s17 = sshll.u32 %s438_s5, 4  ;;  %s366_s18 = smov [#allocation7]   ;;  %s62_s17 = int_to_ptr.hbm [resolvable:$true] %s61_s17 }
   0xa   :  { %s48_s19 = sshll.u32 %s366_s18, 4  ;;  %s367_s0 = smov [#allocation8]   ;;  %s49_s19 = int_to_ptr.vmem [resolvable:$true] %s48_s19 }
   0xb   :  { %54 = dma.hbm_to_vmem [thread:$0]  %s47_s15, 2048, %s49_s19, [#allocation6], %s363_s9, %s363_s9, %s364_s10  }
   0xc   :  { %s63_s20 = sshll.u32 %s367_s0, 4  ;;  %s64_s20 = int_to_ptr.vmem [resolvable:$true] %s63_s20 }
   0xd   :  { %69 = dma.hbm_to_vmem [thread:$0]  %s62_s17, 2048, %s64_s20, [#allocation9], %s363_s9, %s363_s9, %s364_s10  }
   0xe   :  { %354 = dma.done.wait [#allocation3], 128  }
   0xf   :  { %355 = vsyncadd [#allocation3], 4294967168 }
  0x10   :  { %356 = dma.done.wait [#allocation6], 2560  }
  0x11   :  { %357 = vsyncadd [#allocation6], 4294964736 }
  0x12   :  { %358 = dma.done.wait [#allocation9], 2048  }
  0x13   :  { %359 = vsyncadd [#allocation9], 4294965248  ;;  %v92_v0 = vld [vmem:[#allocation5 + $0x18] sm:$0xff]  ;;  %v91_v1 = vld [vmem:[#allocation5 + $0x10] sm:$0xff]  ;;  %vm97_vm0 = vcmask 261120   ;;  %s368_s24 = smov [#allocation10]  }
  0x14   :  { %113 = vmatpush.msra.mxu0 %v92_v0  ;;  %v137_v2 = vld [vmem:[#allocation7 + $0x78] sm:$0xff]  ;;  %v90_v3 = vld [vmem:[#allocation5 + $0x8] sm:$0xff]  ;;  %v136_v4 = vld [vmem:[#allocation7 + $0x70] sm:$0xff]  ;;  %s209_s25 = sshll.u32 %s368_s24, 4  ;;  %s211_s28 = sshll.u32 %s440_s7, 4  ;;  %s210_s25 = int_to_ptr.vmem [resolvable:$true] %s209_s25  ;;  %s212_s28 = int_to_ptr.hbm [resolvable:$true] %s211_s28 }
  0x15   :  { %142 = vmatpush.msra.mxu1 %v137_v2  ;;  %v135_v5 = vld [vmem:[#allocation7 + $0x68] sm:$0xff]  ;;  %v89_v6 = vld [vmem:[#allocation5] sm:$0xff]  ;;  %v88_v7 = vld [vmem:[#allocation2] sm:$0xff] }
  0x16   :  { %114 = vmatpush.msra.mxu0 %v91_v1  ;;  %v134_v8 = vld [vmem:[#allocation7 + $0x60] sm:$0xff]  ;;  %v133_v9 = vld [vmem:[#allocation7 + $0x58] sm:$0xff]  ;;  %v132_v10 = vld [vmem:[#allocation7 + $0x50] sm:$0xff] }
  0x17   :  { %143 = vmatpush.msra.mxu1 %v136_v4  ;;  %v131_v11 = vld [vmem:[#allocation7 + $0x48] sm:$0xff]  ;;  %v130_v12 = vld [vmem:[#allocation7 + $0x40] sm:$0xff]  ;;  %v129_v13 = vld [vmem:[#allocation7 + $0x38] sm:$0xff] }
  0x18   :  { %115 = vmatpush.msra.mxu0 %v90_v3  ;;  %v128_v14 = vld [vmem:[#allocation7 + $0x30] sm:$0xff]  ;;  %v127_v15 = vld [vmem:[#allocation7 + $0x28] sm:$0xff]  ;;  %v126_v16 = vld [vmem:[#allocation7 + $0x20] sm:$0xff] }
  0x19   :  { %144 = vmatpush.msra.mxu1 %v135_v5  ;;  %v125_v17 = vld [vmem:[#allocation7 + $0x18] sm:$0xff]  ;;  %v124_v18 = vld [vmem:[#allocation7 + $0x10] sm:$0xff]  ;;  %v123_v19 = vld [vmem:[#allocation7 + $0x8] sm:$0xff] }
  0x1a   :  { %116 = vmatpush.msra.mxu0 %v89_v6  ;;  %v122_v20 = vld [vmem:[#allocation7] sm:$0xff]  ;;  %v178_v21 = vld [vmem:[#allocation8 + $0x78] sm:$0xff]  ;;  %v177_v22 = vld [vmem:[#allocation8 + $0x70] sm:$0xff] }
  0x1b   :  { %223 = vmatmul.msk.f32.vlgmr.msra.gmra.mxu0 %vm97_vm0, %v88_v7  ;;  %145 = vmatpush.msra.mxu1 %v134_v8  ;;  %v176_v23 = vld [vmem:[#allocation8 + $0x68] sm:$0xff]  ;;  %v175_v24 = vld [vmem:[#allocation8 + $0x60] sm:$0xff]  ;;  %v174_v25 = vld [vmem:[#allocation8 + $0x58] sm:$0xff] }
  0x1c   :  { %183 = vmatpush.msra.mxu2 %v178_v21  ;;  %v173_v26 = vld [vmem:[#allocation8 + $0x50] sm:$0xff]  ;;  %v172_v27 = vld [vmem:[#allocation8 + $0x48] sm:$0xff]  ;;  %v171_v28 = vld [vmem:[#allocation8 + $0x40] sm:$0xff] }
  0x1d   :  { %146 = vmatpush.msra.mxu1 %v133_v9  ;;  %v170_v29 = vld [vmem:[#allocation8 + $0x38] sm:$0xff]  ;;  %v169_v30 = vld [vmem:[#allocation8 + $0x30] sm:$0xff]  ;;  %v168_v31 = vld [vmem:[#allocation8 + $0x28] sm:$0xff] }
  0x1e   :  { %184 = vmatpush.msra.mxu2 %v177_v22  ;;  %v167_v32 = vld [vmem:[#allocation8 + $0x20] sm:$0xff]  ;;  %v166_v33 = vld [vmem:[#allocation8 + $0x18] sm:$0xff]  ;;  %v165_v38 = vld [vmem:[#allocation8 + $0x10] sm:$0xff] }
  0x1f   :  { %147 = vmatpush.msra.mxu1 %v132_v10  ;;  %v231_v34 = vld [vmem:[%s435_s2] ss:$0 sm:$0xff]  ;;  %v164_v39 = vld [vmem:[#allocation8 + $0x8] sm:$0xff]  ;;  %v163_v40 = vld [vmem:[#allocation8] sm:$0xff] }
  0x20   :  { %185 = vmatpush.msra.mxu2 %v176_v23  ;;  %v232_v41 = vld [vmem:[%s437_s4] ss:$0 sm:$0xff] }
  0x21   :  { %148 = vmatpush.msra.mxu1 %v131_v11  ;;  %v233_v45 = vld [vmem:[%s439_s6] ss:$0 sm:$0xff] }
  0x22   :  { %186 = vmatpush.msra.mxu2 %v175_v24 }
  0x23   :  { %149 = vmatpush.msra.mxu1 %v130_v12 }
  0x24   :  { %187 = vmatpush.msra.mxu2 %v174_v25 }
  0x25   :  { %150 = vmatpush.msra.mxu1 %v129_v13 }
  0x26   :  { %188 = vmatpush.msra.mxu2 %v173_v26 }
  0x27   :  { %151 = vmatpush.msra.mxu1 %v128_v14 }
  0x28   :  { %189 = vmatpush.msra.mxu2 %v172_v27 }
  0x29   :  { %152 = vmatpush.msra.mxu1 %v127_v15 }
  0x2a   :  { %190 = vmatpush.msra.mxu2 %v171_v28 }
  0x2b   :  { %153 = vmatpush.msra.mxu1 %v126_v16 }
  0x2c   :  { %191 = vmatpush.msra.mxu2 %v170_v29 }
  0x2d   :  { %154 = vmatpush.msra.mxu1 %v125_v17 }
  0x2e   :  { %192 = vmatpush.msra.mxu2 %v169_v30 }
  0x2f   :  { %155 = vmatpush.msra.mxu1 %v124_v18 }
  0x30   :  { %193 = vmatpush.msra.mxu2 %v168_v31 }
  0x31   :  { %156 = vmatpush.msra.mxu1 %v123_v19 }
  0x32   :  { %194 = vmatpush.msra.mxu2 %v167_v32 }
  0x33   :  { %157 = vmatpush.msra.mxu1 %v122_v20 }
  0x34   :  { %195 = vmatpush.msra.mxu2 %v166_v33 }
  0x36   :  { %196 = vmatpush.msra.mxu2 %v165_v38 }
  0x38   :  { %197 = vmatpush.msra.mxu2 %v164_v39 }
  0x3a   :  { %198 = vmatpush.msra.mxu2 %v163_v40 }
  0x98   :  { %v118_v35 = vpop.f32.mrf.mxu0 }
  0x99   :  { %v119_v36 = vadd.f32 %v231_v34, %v118_v35 }
  0x9b   :  { %v121_v37 = vmax.f32 %v119_v36, 0.0 }
  0x9d   :  { %158 = vmatmul.f32.vlgmr.msra.gmra.mxu1 %v121_v37 }
 0x11a   :  { %v159_v42 = vpop.f32.mrf.mxu1 }
 0x11b   :  { %v160_v43 = vadd.f32 %v232_v41, %v159_v42 }
 0x11d   :  { %v162_v44 = vmax.f32 %v160_v43, 0.0 }
 0x11f   :  { %199 = vmatmul.f32.vlgmr.msra.gmra.mxu2 %v162_v44 }
 0x1a2   :  { %v200_v46 = vpop.f32.mrf.mxu2 }
 0x1a3   :  { %v201_v47 = vadd.f32 %v233_v45, %v200_v46 }
 0x1a5   :  { %203 = vst [vmem:[#allocation10] sm:$0xff] %v201_v47 }
 0x1a6   :  { %214 = dma.vmem_to_hbm [thread:$0]  %s210_s25, 128, %s212_s28, [#allocation4]  }
 0x1a7   :  { %360 = dma.done.wait [#allocation4], 128  }
 0x1a8   :  { %361 = vsyncadd [#allocation4], 4294967168 }
 0x1a9   :  { %219 = vsyncpa [#allocation3], 1 }
 0x1aa   :  { %220 = vsyncpa [#allocation6], 1 }
 0x1ab   :  { %221 = vsyncpa [#allocation9], 1 }
 0x1ac   :  { %222 = vsyncpa [#allocation4], 1 }

</bundles_post_ra>
